<compile_context>
chip_gen: v7x
topology: tpu7x:2x2x1
jax: 0.10.0
libtpu: 0.0.40
codegen_flags: <defaults>
</compile_context>

<pallas_src>
import functools

import jax
import jax.numpy as jnp
from jax.experimental import pallas as pl
from jax.experimental.pallas import tpu as pltpu


def _round_up(x, m):
    return (x + m - 1) // m * m


# --------------------------------------------------------------------------- #
# Kernel
# --------------------------------------------------------------------------- #
def lstm_cell_kernel(x_ref, h_ref, c_ref, wx_ref, wh_ref, b_ref,
                     h_out_ref, c_out_ref):
    Hp = c_ref.shape[-1]                       # padded hidden width (lane aligned)

    # Two bf16 MXU matmuls accumulated in f32.
    gates = jnp.dot(x_ref[...], wx_ref[...], preferred_element_type=jnp.float32)
    gates = gates + jnp.dot(h_ref[...], wh_ref[...],
                            preferred_element_type=jnp.float32)
    gates = gates + b_ref[...]                 # f32 bias, broadcast [1, 3*Hp]

    # Gate column blocks are lane aligned (Hp % 128 == 0) -> free slices.
    # sigmoid(x) = 0.5*tanh(0.5*x) + 0.5  (single EUP op per gate)
    i_t = 0.5 * jnp.tanh(0.5 * gates[:, 0 * Hp:1 * Hp]) + 0.5
    o_t = 0.5 * jnp.tanh(0.5 * gates[:, 1 * Hp:2 * Hp]) + 0.5
    c_hat = jnp.tanh(gates[:, 2 * Hp:3 * Hp])

    c_t = c_ref[...] + i_t * c_hat             # (no forget gate — per module spec)
    h_t = o_t * jnp.tanh(c_t)

    h_out_ref[...] = h_t.astype(h_out_ref.dtype)
    c_out_ref[...] = c_t                       # f32 cell state


# --------------------------------------------------------------------------- #
# One-time parameter preparation (pad + bf16 cast) — hoisted out of the step.
# --------------------------------------------------------------------------- #
def prepare_params(params):
    """Pad each gate block to a lane-aligned H_pad column block, cast to bf16.

    params: (wx [I, 3H], wh [H, 3H], b [3H]), gate order [i | o | c].
    returns (wx_p [I_pad, 3*H_pad] bf16, wh_p [H_pad, 3*H_pad] bf16,
             b_p [1, 3*H_pad] f32).
    """
    wx, wh, b = params
    I = wx.shape[0]
    H = wh.shape[0]
    I_pad = _round_up(I, 128)
    H_pad = _round_up(H, 128)

    wx_p = jnp.zeros((I_pad, 3 * H_pad), jnp.bfloat16)
    wh_p = jnp.zeros((H_pad, 3 * H_pad), jnp.bfloat16)
    b_p = jnp.zeros((1, 3 * H_pad), jnp.float32)
    for g in range(3):
        col = slice(g * H_pad, g * H_pad + H)
        wx_p = wx_p.at[:I, col].set(wx[:, g * H:(g + 1) * H].astype(jnp.bfloat16))
        wh_p = wh_p.at[:H, col].set(wh[:, g * H:(g + 1) * H].astype(jnp.bfloat16))
        b_p = b_p.at[0, col].set(b[g * H:(g + 1) * H].astype(jnp.float32))
    return wx_p, wh_p, b_p


def _pad_cast(a, shape, dtype):
    """Zero-pad `a` to `shape` and cast to `dtype`; no-op ops when already there."""
    if a.shape == shape and a.dtype == dtype:
        return a
    if a.shape == shape:
        return a.astype(dtype)
    out = jnp.zeros(shape, dtype)
    return out.at[:a.shape[0], :a.shape[1]].set(a.astype(dtype))


# --------------------------------------------------------------------------- #
# Step wrapper
# --------------------------------------------------------------------------- #
@functools.partial(jax.jit, static_argnames=("batch_tile",))
def lstm_cell_original(x_t, state, padded_params, *, batch_tile=512):
    """JAX wrapper reproducing LSTMCellOriginal.forward semantics.

    padded_params must come from prepare_params() (done once at init).
    """
    h_prev, c_prev = state
    wx_p, wh_p, b_p = padded_params            # bf16 [I_pad,3H_pad], bf16 [H_pad,3H_pad], f32 [1,3H_pad]

    B, I = x_t.shape
    H = h_prev.shape[1]
    I_pad = wx_p.shape[0]
    H_pad = wh_p.shape[0]
    assert wx_p.shape[1] == 3 * H_pad and wh_p.shape[1] == 3 * H_pad

    # --- adaptive batch tiling ---------------------------------------------
    # At least 2 grid steps when possible (feeds both v7x TensorCores / gives
    # the software pipeline something to overlap); waste bounded by sublanes.
    B8 = _round_up(B, 8)
    min_steps = 2 if B8 >= 16 else 1
    n_steps = max(pl.cdiv(B8, batch_tile), min_steps)
    TB = _round_up(pl.cdiv(B8, n_steps), 8)
    n_steps = pl.cdiv(B8, TB)
    B_pad = n_steps * TB

    # --- pad / cast activations (skipped when already aligned) --------------
    x_p = _pad_cast(x_t, (B_pad, I_pad), jnp.bfloat16)
    h_p = _pad_cast(h_prev, (B_pad, H_pad), jnp.bfloat16)
    c_p = _pad_cast(c_prev, (B_pad, H_pad), jnp.float32)

    # --- VMEM budget (conservative: everything double-buffered) -------------
    h_out_itemsize = jnp.dtype(x_t.dtype).itemsize
    tile_bytes = TB * (I_pad * 2 + H_pad * 2 + H_pad * 4        # x, h, c in
                       + H_pad * h_out_itemsize + H_pad * 4)    # h, c out
    weight_bytes = (I_pad + H_pad) * 3 * H_pad * 2 + 8 * 3 * H_pad * 4
    needed = 2 * (tile_bytes + weight_bytes)
    vmem_limit = int(min(max(needed + (4 << 20), 32 << 20), 64 << 20))

    grid = (n_steps,)

    h_out, c_out = pl.pallas_call(
        lstm_cell_kernel,
        out_shape=(
            jax.ShapeDtypeStruct((B_pad, H_pad), x_t.dtype),     # h_t
            jax.ShapeDtypeStruct((B_pad, H_pad), jnp.float32),   # c_t (f32)
        ),
        grid=grid,
        in_specs=[
            pl.BlockSpec((TB, I_pad), lambda i: (i, 0)),          # x tile
            pl.BlockSpec((TB, H_pad), lambda i: (i, 0)),          # h tile
            pl.BlockSpec((TB, H_pad), lambda i: (i, 0)),          # c tile
            pl.BlockSpec((I_pad, 3 * H_pad), lambda i: (0, 0)),   # Wx (resident)
            pl.BlockSpec((H_pad, 3 * H_pad), lambda i: (0, 0)),   # Wh (resident)
            pl.BlockSpec((1, 3 * H_pad), lambda i: (0, 0)),       # bias (resident)
        ],
        out_specs=(
            pl.BlockSpec((TB, H_pad), lambda i: (i, 0)),
            pl.BlockSpec((TB, H_pad), lambda i: (i, 0)),
        ),
        compiler_params=pltpu.CompilerParams(
            dimension_semantics=("parallel",),
            vmem_limit_bytes=vmem_limit),
    )(x_p, h_p, c_p, wx_p, wh_p, b_p)

    # --- slice back (skipped when no padding was added) ----------------------
    if (B_pad, H_pad) != (B, H):
        h_out = h_out[:B, :H]
        c_out = c_out[:B, :H]
    h_t = h_out
    c_t = c_out.astype(c_prev.dtype)
    return h_t, c_t


# --------------------------------------------------------------------------- #
# Init + pure-JAX reference (for validation)
# --------------------------------------------------------------------------- #
def init_params(key, input_size, hidden_size):
    """Deterministic init mimicking nn.Linear default (uniform +-1/sqrt(fan_in)).

    Stored transposed and split into x-part / h-part:
      Wx [input_size, 3*hidden], Wh [hidden, 3*hidden], b [3*hidden]
    with gate column blocks ordered [i | o | c].
    """
    fan_in = input_size + hidden_size
    bound = 1.0 / (fan_in ** 0.5)
    kws = jax.random.split(key, 6)
    wxs, whs, bs = [], [], []
    for g in range(3):
        w = jax.random.uniform(kws[2 * g], (fan_in, hidden_size),
                               minval=-bound, maxval=bound, dtype=jnp.float32)
        bb = jax.random.uniform(kws[2 * g + 1], (hidden_size,),
                                minval=-bound, maxval=bound, dtype=jnp.float32)
        wxs.append(w[:input_size])
        whs.append(w[input_size:])
        bs.append(bb)
    wx = jnp.concatenate(wxs, axis=1)
    wh = jnp.concatenate(whs, axis=1)
    b = jnp.concatenate(bs, axis=0)
    return wx, wh, b


def lstm_cell_reference(x_t, state, params):
    """Pure-JAX f32 reference of the PyTorch forward."""
    h_prev, c_prev = state
    wx, wh, b = params
    H = h_prev.shape[1]
    gates = x_t @ wx + h_prev @ wh + b
    i_t = jax.nn.sigmoid(gates[:, 0 * H:1 * H])
    o_t = jax.nn.sigmoid(gates[:, 1 * H:2 * H])
    c_hat = jnp.tanh(gates[:, 2 * H:3 * H])
    c_t = c_prev + i_t * c_hat
    h_t = o_t * jnp.tanh(c_t)
    return h_t, c_t


# --------------------------------------------------------------------------- #
if __name__ == "__main__":
    def run_case(B, INPUT_SIZE, HIDDEN_SIZE, seed):
        key = jax.random.PRNGKey(seed)
        k_x, k_h, k_c, k_p = jax.random.split(key, 4)
        x_t = jax.random.normal(k_x, (B, INPUT_SIZE), dtype=jnp.float32)
        h_prev = jax.random.normal(k_h, (B, HIDDEN_SIZE), dtype=jnp.float32)
        c_prev = jax.random.normal(k_c, (B, HIDDEN_SIZE), dtype=jnp.float32)
        params = init_params(k_p, INPUT_SIZE, HIDDEN_SIZE)
        padded = prepare_params(params)                 # one-time pad + bf16 cast

        h_t, c_t = lstm_cell_original(x_t, (h_prev, c_prev), padded)
        jax.block_until_ready((h_t, c_t))

        h_ref, c_ref = lstm_cell_reference(x_t, (h_prev, c_prev), params)
        # bf16 activations/weights on the MXU path -> loosen tolerance vs f32 ref.
        assert h_t.shape == h_ref.shape and c_t.shape == c_ref.shape
        assert jnp.allclose(h_t, h_ref, atol=2e-2, rtol=2e-2), "h_t mismatch"
        assert jnp.allclose(c_t, c_ref, atol=2e-2, rtol=2e-2), "c_t mismatch"

    # Small module-consistent shapes (padded path, grid=(1,)).
    run_case(B=2, INPUT_SIZE=16, HIDDEN_SIZE=32, seed=0)
    # Already-aligned path: no activation pad / output slice, 2 grid steps.
    run_case(B=16, INPUT_SIZE=128, HIDDEN_SIZE=128, seed=1)

    print("KERNEL_OK")
</pallas_src>

<mosaic_0001>
module attributes {stable_mosaic.version = 11 : i64} {
  func.func @lstm_cell_kernel(%arg0: i32, %arg1: memref<8x128xbf16, #tpu.memory_space<vmem>>, %arg2: memref<8x128xbf16, #tpu.memory_space<vmem>>, %arg3: memref<8x128xf32, #tpu.memory_space<vmem>>, %arg4: memref<128x384xbf16, #tpu.memory_space<vmem>>, %arg5: memref<128x384xbf16, #tpu.memory_space<vmem>>, %arg6: memref<1x384xf32, #tpu.memory_space<vmem>>, %arg7: memref<8x128xf32, #tpu.memory_space<vmem>>, %arg8: memref<8x128xf32, #tpu.memory_space<vmem>>) attributes {dimension_semantics = [#tpu.dimension_semantics<parallel>], iteration_bounds = array<i64: 1>, scalar_prefetch = 0 : i64, scratch_operands = 0 : i64, tpu.core_type = #tpu.core_type<tc>, window_params = [{transform_indices = @transform_0, window_bounds = array<i64: 8, 128>}, {transform_indices = @transform_1, window_bounds = array<i64: 8, 128>}, {transform_indices = @transform_2, window_bounds = array<i64: 8, 128>}, {pipeline_mode = #tpu.pipeline_mode<synchronous>, transform_indices = @transform_3, window_bounds = array<i64: 128, 384>}, {pipeline_mode = #tpu.pipeline_mode<synchronous>, transform_indices = @transform_4, window_bounds = array<i64: 128, 384>}, {pipeline_mode = #tpu.pipeline_mode<synchronous>, transform_indices = @transform_5, window_bounds = array<i64: 1, 384>}, {transform_indices = @transform_6, window_bounds = array<i64: 8, 128>}, {transform_indices = @transform_7, window_bounds = array<i64: 8, 128>}]} {
    %c0 = arith.constant 0 : index
    %c0_0 = arith.constant 0 : index
    %0 = vector.load %arg1[%c0, %c0_0] : memref<8x128xbf16, #tpu.memory_space<vmem>>, vector<8x128xbf16>
    %c0_1 = arith.constant 0 : index
    %c0_2 = arith.constant 0 : index
    %1 = vector.load %arg4[%c0_1, %c0_2] : memref<128x384xbf16, #tpu.memory_space<vmem>>, vector<128x384xbf16>
    %cst = arith.constant dense<0.000000e+00> : vector<8x384xf32>
    %2 = tpu.matmul %0, %1, %cst {dimension_numbers = #tpu.dot_dimension_numbers<[1], [0], [0], [1], [0, 0, 1, 1], [], []>} : vector<8x128xbf16>, vector<128x384xbf16>, vector<8x384xf32> -> vector<8x384xf32>
    %c0_3 = arith.constant 0 : index
    %c0_4 = arith.constant 0 : index
    %3 = vector.load %arg2[%c0_3, %c0_4] : memref<8x128xbf16, #tpu.memory_space<vmem>>, vector<8x128xbf16>
    %c0_5 = arith.constant 0 : index
    %c0_6 = arith.constant 0 : index
    %4 = vector.load %arg5[%c0_5, %c0_6] : memref<128x384xbf16, #tpu.memory_space<vmem>>, vector<128x384xbf16>
    %cst_7 = arith.constant dense<0.000000e+00> : vector<8x384xf32>
    %5 = tpu.matmul %3, %4, %cst_7 {dimension_numbers = #tpu.dot_dimension_numbers<[1], [0], [0], [1], [0, 0, 1, 1], [], []>} : vector<8x128xbf16>, vector<128x384xbf16>, vector<8x384xf32> -> vector<8x384xf32>
    %6 = arith.addf %2, %5 : vector<8x384xf32>
    %c0_8 = arith.constant 0 : index
    %c0_9 = arith.constant 0 : index
    %7 = vector.load %arg6[%c0_8, %c0_9] : memref<1x384xf32, #tpu.memory_space<vmem>>, vector<1x384xf32>
    %8 = vector.broadcast %7 : vector<1x384xf32> to vector<8x384xf32>
    %9 = arith.addf %6, %8 : vector<8x384xf32>
    %10 = vector.extract_strided_slice %9 {offsets = [0, 0], sizes = [8, 128], strides = [1, 1]} : vector<8x384xf32> to vector<8x128xf32>
    %cst_10 = arith.constant 5.000000e-01 : f32
    %11 = vector.broadcast %cst_10 : f32 to vector<8x128xf32>
    %12 = arith.mulf %11, %10 : vector<8x128xf32>
    %13 = math.tanh %12 : vector<8x128xf32>
    %cst_11 = arith.constant 5.000000e-01 : f32
    %14 = vector.broadcast %cst_11 : f32 to vector<8x128xf32>
    %15 = arith.mulf %14, %13 : vector<8x128xf32>
    %cst_12 = arith.constant 5.000000e-01 : f32
    %16 = vector.broadcast %cst_12 : f32 to vector<8x128xf32>
    %17 = arith.addf %15, %16 : vector<8x128xf32>
    %18 = vector.extract_strided_slice %9 {offsets = [0, 128], sizes = [8, 128], strides = [1, 1]} : vector<8x384xf32> to vector<8x128xf32>
    %cst_13 = arith.constant 5.000000e-01 : f32
    %19 = vector.broadcast %cst_13 : f32 to vector<8x128xf32>
    %20 = arith.mulf %19, %18 : vector<8x128xf32>
    %21 = math.tanh %20 : vector<8x128xf32>
    %cst_14 = arith.constant 5.000000e-01 : f32
    %22 = vector.broadcast %cst_14 : f32 to vector<8x128xf32>
    %23 = arith.mulf %22, %21 : vector<8x128xf32>
    %cst_15 = arith.constant 5.000000e-01 : f32
    %24 = vector.broadcast %cst_15 : f32 to vector<8x128xf32>
    %25 = arith.addf %23, %24 : vector<8x128xf32>
    %26 = vector.extract_strided_slice %9 {offsets = [0, 256], sizes = [8, 128], strides = [1, 1]} : vector<8x384xf32> to vector<8x128xf32>
    %27 = math.tanh %26 : vector<8x128xf32>
    %c0_16 = arith.constant 0 : index
    %c0_17 = arith.constant 0 : index
    %28 = vector.load %arg3[%c0_16, %c0_17] : memref<8x128xf32, #tpu.memory_space<vmem>>, vector<8x128xf32>
    %29 = arith.mulf %17, %27 : vector<8x128xf32>
    %30 = arith.addf %28, %29 : vector<8x128xf32>
    %31 = math.tanh %30 : vector<8x128xf32>
    %32 = arith.mulf %25, %31 : vector<8x128xf32>
    %c0_18 = arith.constant 0 : index
    %c0_19 = arith.constant 0 : index
    %33 = vector.load %arg7[%c0_18, %c0_19] : memref<8x128xf32, #tpu.memory_space<vmem>>, vector<8x128xf32>
    tpu.vector_store %arg7[%c0_18, %c0_19], %32 {strides = array<i32>} : memref<8x128xf32, #tpu.memory_space<vmem>>, vector<8x128xf32>,
    %c0_20 = arith.constant 0 : index
    %c0_21 = arith.constant 0 : index
    %34 = vector.load %arg8[%c0_20, %c0_21] : memref<8x128xf32, #tpu.memory_space<vmem>>, vector<8x128xf32>
    tpu.vector_store %arg8[%c0_20, %c0_21], %30 {strides = array<i32>} : memref<8x128xf32, #tpu.memory_space<vmem>>, vector<8x128xf32>,
    return
  }
  func.func @transform_0(%arg0: i32) -> (i32, i32) {
    %c0_i32 = arith.constant 0 : i32
    %c0_i32_0 = arith.constant 0 : i32
    return %arg0, %c0_i32 : i32, i32
  }
  func.func @transform_1(%arg0: i32) -> (i32, i32) {
    %c0_i32 = arith.constant 0 : i32
    %c0_i32_0 = arith.constant 0 : i32
    return %arg0, %c0_i32 : i32, i32
  }
  func.func @transform_2(%arg0: i32) -> (i32, i32) {
    %c0_i32 = arith.constant 0 : i32
    %c0_i32_0 = arith.constant 0 : i32
    return %arg0, %c0_i32 : i32, i32
  }
  func.func @transform_3(%arg0: i32) -> (i32, i32) {
    %c0_i32 = arith.constant 0 : i32
    %c0_i32_0 = arith.constant 0 : i32
    %c0_i32_1 = arith.constant 0 : i32
    return %c0_i32, %c0_i32_0 : i32, i32
  }
  func.func @transform_4(%arg0: i32) -> (i32, i32) {
    %c0_i32 = arith.constant 0 : i32
    %c0_i32_0 = arith.constant 0 : i32
    %c0_i32_1 = arith.constant 0 : i32
    return %c0_i32, %c0_i32_0 : i32, i32
  }
  func.func @transform_5(%arg0: i32) -> (i32, i32) {
    %c0_i32 = arith.constant 0 : i32
    %c0_i32_0 = arith.constant 0 : i32
    %c0_i32_1 = arith.constant 0 : i32
    return %c0_i32, %c0_i32_0 : i32, i32
  }
  func.func @transform_6(%arg0: i32) -> (i32, i32) {
    %c0_i32 = arith.constant 0 : i32
    %c0_i32_0 = arith.constant 0 : i32
    return %arg0, %c0_i32 : i32, i32
  }
  func.func @transform_7(%arg0: i32) -> (i32, i32) {
    %c0_i32 = arith.constant 0 : i32
    %c0_i32_0 = arith.constant 0 : i32
    return %arg0, %c0_i32 : i32, i32
  }
}

</mosaic_0001>

<bundles_post_ra>
// kernel: lstm_cell_original.1
= control target key start
LH: loop header
LB: loop body
LE: loop exit
PB: predicated region body
PF: predicated region fallthrough
CT: control target
= control target key end

     0   :  { %13 = vsyncpa [#allocation3], 0  ;;  %s928_s0 = inlined_call_operand.vmem [shape: bf16[8,128], index: 0, kind: input, shape index: {}]   ;;  %s929_s1 = inlined_call_operand.vmem [shape: bf16[8,128], index: 1, kind: input, shape index: {}]   ;;  %s930_s2 = inlined_call_operand.vmem [shape: f32[8,128], index: 2, kind: input, shape index: {}]   ;;  %s931_s3 = inlined_call_operand.hbm [shape: bf16[128,384], index: 3, kind: input, shape index: {}]   ;;  %s932_s4 = inlined_call_operand.hbm [shape: bf16[128,384], index: 4, kind: input, shape index: {}]   ;;  %s933_s5 = inlined_call_operand.vmem [shape: f32[1,384], index: 5, kind: input, shape index: {}]   ;;  %s934_s6 = inlined_call_operand.vmem [shape: f32[8,128], index: 6, kind: output, shape index: {0}]   ;;  %s935_s7 = inlined_call_operand.vmem [shape: f32[8,128], index: 7, kind: output, shape index: {1}]  }
   0x1   :  { %14 = vsyncpa [#allocation5], 0  ;;  %s817_s24 = smov [#allocation2]   ;;  %s769_s28 = scalar_lea.hbm %s931_s3, 3072 }
   0x2   :  { %s26_s25 = sshll.u32 %s817_s24, 4  ;;  %p770_p0 = scmp.ne.s32.totalorder %s931_s3, %s769_s28  ;;  %s27_s25 = int_to_ptr.vmem [resolvable:$true] %s26_s25 }
   0x3   :  { %p773_p1 = scmp.lt.u32.totalorder %s769_s28, %s931_s3 }
   0x5   :  { %p775_p2 = pnand %p773_p1, %p770_p0 }
   0x7   :  { %778 = shalt.err (!%p775_p2)
}
   0x8   :  { %s779_s10 = scalar_lea.vmem %s27_s25, 3072  ;;  %p784_p4 = scmp.lt.s32.totalorder %s27_s25, %s27_s25 }
   0x9   :  { %p780_p3 = scmp.ne.s32.totalorder %s27_s25, %s779_s10  ;;  %p785_p5 = scmp.lt.s32.totalorder %s779_s10, %s779_s10 }
   0xb   :  { %p786_p6 = por %p785_p5, %p784_p4 }
   0xd   :  { %p787_p7 = pnand %p786_p6, %p780_p3 }
   0xf   :  { %790 = shalt.err (!%p787_p7)
}
  0x10   :  { %s818_s11 = smov 192   ;;  %s819_s12 = smov 12  }
  0x11   :  { %32 = dma.hbm_to_vmem [thread:$0]  %s931_s3, 3072, %s27_s25, [#allocation3], %s818_s11, %s818_s11, %s819_s12  }
  0x12   :  { %s820_s15 = smov [#allocation4]   ;;  %s791_s19 = scalar_lea.hbm %s932_s4, 3072 }
  0x13   :  { %s38_s16 = sshll.u32 %s820_s15, 4  ;;  %p792_p8 = scmp.ne.s32.totalorder %s932_s4, %s791_s19  ;;  %s39_s16 = int_to_ptr.vmem [resolvable:$true] %s38_s16 }
  0x14   :  { %p795_p9 = scmp.lt.u32.totalorder %s791_s19, %s932_s4 }
  0x16   :  { %p797_p10 = pnand %p795_p9, %p792_p8 }
  0x18   :  { %800 = shalt.err (!%p797_p10)
}
  0x19   :  { %s801_s24 = scalar_lea.vmem %s39_s16, 3072  ;;  %p806_p12 = scmp.lt.s32.totalorder %s39_s16, %s39_s16 }
  0x1a   :  { %p802_p11 = scmp.ne.s32.totalorder %s39_s16, %s801_s24  ;;  %p807_p13 = scmp.lt.s32.totalorder %s801_s24, %s801_s24 }
  0x1c   :  { %p808_p0 = por %p807_p13, %p806_p12 }
  0x1e   :  { %p809_p1 = pnand %p808_p0, %p802_p11 }
  0x20   :  { %812 = shalt.err (!%p809_p1)
}
  0x21   :  { %44 = dma.hbm_to_vmem [thread:$0]  %s932_s4, 3072, %s39_s16, [#allocation5], %s818_s11, %s818_s11, %s819_s12  }
  0x22   :  { %813 = dma.done.wait [#allocation3], 3072  }
  0x23   :  { %814 = vsyncadd [#allocation3], 4294964224 }
  0x24   :  { %815 = dma.done.wait [#allocation5], 3072  }
  0x25   :  { %816 = vsyncadd [#allocation5], 4294964224  ;;  %v821_v0 = vmov 0.0   ;;  %v822_v1 = vmov 0   ;;  %vm823_vm0 = vmmov 0   ;;  %v540_v60 = vlaneseq }
  0x26   :  { %650 = vmatprep.subr.bf16.mxu1 %v821_v0  ;;  %280 = vmatprep.mubr.bf16.mxu0 %v822_v1  ;;  %v697_v2 = vld [vmem:[#allocation4 + $0x4] ss:$12 sps:$4 sm:$0xff]   ;;  %v699_v3 = vld [vmem:[#allocation4 + $0x8] ss:$12 sps:$4 sm:$0xff]   ;;  %v700_v4 = vld [vmem:[#allocation4] ss:$12 sps:$4 sm:$0xff]  }
  0x27   :  { %666 = vmatprep.mubr.msk.bf16.mxu1 %vm823_vm0, %v821_v0  ;;  %248 = vmatprep.subr.bf16.mxu0 %v697_v2  ;;  %v701_v5 = vld [vmem:[#allocation4 + $0x1c] ss:$12 sps:$4 sm:$0xff]   ;;  %v703_v6 = vld [vmem:[#allocation4 + $0x20] ss:$12 sps:$4 sm:$0xff]   ;;  %v704_v7 = vld [vmem:[#allocation4 + $0x18] ss:$12 sps:$4 sm:$0xff]  }
  0x28   :  { %651 = vmatpush3.bf16.msra.mxu1 %v699_v3  ;;  %249 = vmatpush1.bf16.msra.mxu0 %v700_v4  ;;  %v705_v8 = vld [vmem:[#allocation4 + $0x34] ss:$12 sps:$4 sm:$0xff]   ;;  %v707_v9 = vld [vmem:[#allocation4 + $0x38] ss:$12 sps:$4 sm:$0xff]   ;;  %v708_v10 = vld [vmem:[#allocation4 + $0x30] ss:$12 sps:$4 sm:$0xff]  }
  0x29   :  { %652 = vmatprep.subr.bf16.mxu1 %v821_v0  ;;  %250 = vmatprep.subr.bf16.mxu0 %v701_v5  ;;  %v709_v11 = vld [vmem:[#allocation4 + $0x4c] ss:$12 sps:$4 sm:$0xff]   ;;  %v711_v12 = vld [vmem:[#allocation4 + $0x50] ss:$12 sps:$4 sm:$0xff]   ;;  %v712_v13 = vld [vmem:[#allocation4 + $0x48] ss:$12 sps:$4 sm:$0xff]  }
  0x2a   :  { %v713_v14 = vld [vmem:[#allocation4 + $0x64] ss:$12 sps:$4 sm:$0xff]   ;;  %v715_v15 = vld [vmem:[#allocation4 + $0x68] ss:$12 sps:$4 sm:$0xff]   ;;  %v716_v16 = vld [vmem:[#allocation4 + $0x60] ss:$12 sps:$4 sm:$0xff]  }
  0x2b   :  { %v717_v17 = vld [vmem:[#allocation4 + $0x7c] ss:$12 sps:$4 sm:$0xff]   ;;  %v719_v18 = vld [vmem:[#allocation4 + $0x80] ss:$12 sps:$4 sm:$0xff]   ;;  %v720_v19 = vld [vmem:[#allocation4 + $0x78] ss:$12 sps:$4 sm:$0xff]  }
  0x2c   :  { %653 = vmatpush3.bf16.msra.mxu1 %v703_v6  ;;  %251 = vmatpush1.bf16.msra.mxu0 %v704_v7  ;;  %v721_v20 = vld [vmem:[#allocation4 + $0x94] ss:$12 sps:$4 sm:$0xff]   ;;  %v723_v21 = vld [vmem:[#allocation4 + $0x98] ss:$12 sps:$4 sm:$0xff]   ;;  %v724_v22 = vld [vmem:[#allocation4 + $0x90] ss:$12 sps:$4 sm:$0xff]  }
  0x2d   :  { %654 = vmatprep.subr.bf16.mxu1 %v821_v0  ;;  %252 = vmatprep.subr.bf16.mxu0 %v705_v8  ;;  %v725_v23 = vld [vmem:[#allocation4 + $0xac] ss:$12 sps:$4 sm:$0xff]   ;;  %v727_v24 = vld [vmem:[#allocation4 + $0xb0] ss:$12 sps:$4 sm:$0xff]   ;;  %v728_v25 = vld [vmem:[#allocation4 + $0xa8] ss:$12 sps:$4 sm:$0xff]  }
  0x2e   :  { %v731_v26 = vld [vmem:[#allocation2 + $0x4] ss:$12 sps:$4 sm:$0xff]   ;;  %v87_v27 = vld [vmem:[%s929_s1] sm:$0xf]  ;;  %v732_v28 = vld [vmem:[#allocation2 + $0x8] ss:$12 sps:$4 sm:$0xff]  }
  0x2f   :  { %v729_v29 = vld [vmem:[#allocation2] ss:$12 sps:$4 sm:$0xff]   ;;  %v735_v30 = vld [vmem:[#allocation2 + $0x1c] ss:$12 sps:$4 sm:$0xff]   ;;  %v733_v32 = vld [vmem:[#allocation2 + $0x18] ss:$12 sps:$4 sm:$0xff]  }
  0x30   :  { %655 = vmatpush3.bf16.msra.mxu1 %v707_v9  ;;  %253 = vmatpush1.bf16.msra.mxu0 %v708_v10  ;;  %v736_v31 = vld [vmem:[#allocation2 + $0x20] ss:$12 sps:$4 sm:$0xff]   ;;  %v740_v34 = vld [vmem:[#allocation2 + $0x38] ss:$12 sps:$4 sm:$0xff]   ;;  %v737_v35 = vld [vmem:[#allocation2 + $0x30] ss:$12 sps:$4 sm:$0xff]  }
  0x31   :  { %656 = vmatprep.subr.bf16.mxu1 %v821_v0  ;;  %254 = vmatprep.subr.bf16.mxu0 %v709_v11  ;;  %v739_v33 = vld [vmem:[#allocation2 + $0x34] ss:$12 sps:$4 sm:$0xff]   ;;  %v743_v36 = vld [vmem:[#allocation2 + $0x4c] ss:$12 sps:$4 sm:$0xff]   ;;  %v744_v37 = vld [vmem:[#allocation2 + $0x50] ss:$12 sps:$4 sm:$0xff]  }
  0x32   :  { %v741_v38 = vld [vmem:[#allocation2 + $0x48] ss:$12 sps:$4 sm:$0xff]   ;;  %v747_v39 = vld [vmem:[#allocation2 + $0x64] ss:$12 sps:$4 sm:$0xff]   ;;  %v745_v41 = vld [vmem:[#allocation2 + $0x60] ss:$12 sps:$4 sm:$0xff]  }
  0x33   :  { %v748_v40 = vld [vmem:[#allocation2 + $0x68] ss:$12 sps:$4 sm:$0xff]   ;;  %v752_v43 = vld [vmem:[#allocation2 + $0x80] ss:$12 sps:$4 sm:$0xff]   ;;  %v749_v44 = vld [vmem:[#allocation2 + $0x78] ss:$12 sps:$4 sm:$0xff]  }
  0x34   :  { %657 = vmatpush3.bf16.msra.mxu1 %v711_v12  ;;  %255 = vmatpush1.bf16.msra.mxu0 %v712_v13  ;;  %v751_v42 = vld [vmem:[#allocation2 + $0x7c] ss:$12 sps:$4 sm:$0xff]   ;;  %v755_v45 = vld [vmem:[#allocation2 + $0x94] ss:$12 sps:$4 sm:$0xff]   ;;  %v756_v46 = vld [vmem:[#allocation2 + $0x98] ss:$12 sps:$4 sm:$0xff]  }
  0x35   :  { %658 = vmatprep.subr.bf16.mxu1 %v821_v0  ;;  %256 = vmatprep.subr.bf16.mxu0 %v713_v14  ;;  %v753_v47 = vld [vmem:[#allocation2 + $0x90] ss:$12 sps:$4 sm:$0xff]   ;;  %v759_v48 = vld [vmem:[#allocation2 + $0xac] ss:$12 sps:$4 sm:$0xff]   ;;  %v757_v50 = vld [vmem:[#allocation2 + $0xa8] ss:$12 sps:$4 sm:$0xff]  }
  0x36   :  { %v760_v49 = vld [vmem:[#allocation2 + $0xb0] ss:$12 sps:$4 sm:$0xff]   ;;  %v54_v51 = vld [vmem:[%s928_s0] sm:$0xf]  ;;  %v541_v61 = vshrl.u32 %v540_v60, 7 }
  0x37   :  { %v538_v63 = vld [vmem:[%s933_s5] sm:$0x7] }
  0x38   :  { %659 = vmatpush3.bf16.msra.mxu1 %v715_v15  ;;  %257 = vmatpush1.bf16.msra.mxu0 %v716_v16  ;;  %v542_v62 = vsub.s32 0, %v541_v61  ;;  %v546_v10 = vsub.s32 1, %v541_v61 }
  0x39   :  { %660 = vmatprep.subr.bf16.mxu1 %v821_v0  ;;  %258 = vmatprep.subr.bf16.mxu0 %v717_v17 }
  0x3a   :  { %v543_v2 = vrot.slane %v538_v63, %v542_v62  ;;  %v547_v17 = vrot.slane %v538_v63, %v546_v10 }
  0x3c   :  { %661 = vmatpush3.bf16.msra.mxu1 %v719_v18  ;;  %259 = vmatpush1.bf16.msra.mxu0 %v720_v19 }
  0x3d   :  { %662 = vmatprep.subr.bf16.mxu1 %v821_v0  ;;  %260 = vmatprep.subr.bf16.mxu0 %v721_v20 }
  0x40   :  { %663 = vmatpush3.bf16.msra.mxu1 %v723_v21  ;;  %261 = vmatpush1.bf16.msra.mxu0 %v724_v22 }
  0x41   :  { %664 = vmatprep.subr.bf16.mxu1 %v821_v0  ;;  %262 = vmatprep.subr.bf16.mxu0 %v725_v23 }
  0x44   :  { %665 = vmatpush3.bf16.msra.mxu1 %v727_v24  ;;  %263 = vmatpush1.bf16.msra.mxu0 %v728_v25  ;;  %v567_v25 = vld [vmem:[%s930_s2] sm:$0xff] }
  0x45   :  { %670 = vmatprep.subr.bf16.mxu1 %v821_v0  ;;  %457 = vmatprep.subr.bf16.mxu0 %v731_v26 }
  0x47   :  { %667 = vmatmul.mubr.bf16.vlgmr.msra.gmra.mrb[0].mxu1 %v87_v27  ;;  %281 = vmatmul.mubr.bf16.vlgmr.msra.gmra.mrb[0].mxu0 %v87_v27 }
  0x48   :  { %671 = vmatpush3.bf16.msra.mxu1 %v732_v28  ;;  %458 = vmatpush1.bf16.msra.mxu0 %v729_v29 }
  0x49   :  { %672 = vmatprep.subr.bf16.mxu1 %v821_v0  ;;  %459 = vmatprep.subr.bf16.mxu0 %v735_v30 }
  0x4a   :  { %686 = vmatprep.mubr.msk.bf16.mxu1 %vm823_vm0, %v821_v0  ;;  %489 = vmatprep.mubr.bf16.mxu0 %v822_v1  ;;  %v550_v1 = vsub.s32 2, %v541_v61 }
  0x4c   :  { %673 = vmatpush3.bf16.msra.mxu1 %v736_v31  ;;  %460 = vmatpush1.bf16.msra.mxu0 %v733_v32  ;;  %v551_v13 = vrot.slane %v538_v63, %v550_v1 }
  0x4d   :  { %674 = vmatprep.subr.bf16.mxu1 %v821_v0  ;;  %461 = vmatprep.subr.bf16.mxu0 %v739_v33 }
  0x50   :  { %675 = vmatpush3.bf16.msra.mxu1 %v740_v34  ;;  %462 = vmatpush1.bf16.msra.mxu0 %v737_v35 }
  0x51   :  { %676 = vmatprep.subr.bf16.mxu1 %v821_v0  ;;  %463 = vmatprep.subr.bf16.mxu0 %v743_v36 }
  0x54   :  { %677 = vmatpush3.bf16.msra.mxu1 %v744_v37  ;;  %464 = vmatpush1.bf16.msra.mxu0 %v741_v38 }
  0x55   :  { %678 = vmatprep.subr.bf16.mxu1 %v821_v0  ;;  %465 = vmatprep.subr.bf16.mxu0 %v747_v39 }
  0x58   :  { %679 = vmatpush3.bf16.msra.mxu1 %v748_v40  ;;  %466 = vmatpush1.bf16.msra.mxu0 %v745_v41 }
  0x59   :  { %680 = vmatprep.subr.bf16.mxu1 %v821_v0  ;;  %467 = vmatprep.subr.bf16.mxu0 %v751_v42 }
  0x5c   :  { %681 = vmatpush3.bf16.msra.mxu1 %v752_v43  ;;  %468 = vmatpush1.bf16.msra.mxu0 %v749_v44 }
  0x5d   :  { %682 = vmatprep.subr.bf16.mxu1 %v821_v0  ;;  %469 = vmatprep.subr.bf16.mxu0 %v755_v45 }
  0x60   :  { %683 = vmatpush3.bf16.msra.mxu1 %v756_v46  ;;  %470 = vmatpush1.bf16.msra.mxu0 %v753_v47 }
  0x61   :  { %684 = vmatprep.subr.bf16.mxu1 %v821_v0  ;;  %471 = vmatprep.subr.bf16.mxu0 %v759_v48 }
  0x64   :  { %685 = vmatpush3.bf16.msra.mxu1 %v760_v49  ;;  %472 = vmatpush1.bf16.msra.mxu0 %v757_v50 }
  0x67   :  { %687 = vmatmul.mubr.bf16.vlgmr.msra.gmra.mrb[4].mxu1 %v54_v51  ;;  %490 = vmatmul.mubr.bf16.vlgmr.msra.gmra.mrb[4].mxu0 %v54_v51 }
 0x11a   :  { %v323_v52 = vpop.f32.mrb[0].mxu1  ;;  %v282_v53 = vpop.f32.mrb[0].mxu0 }
 0x11b   :  { %v668_v54 = vpop.f32.mrb[1].mxu1  ;;  %v284_v55 = vpop.f32.mrb[1].mxu0 }
 0x11c   :  { %v326_v56 = vpop.f32.mrb[2].mxu1  ;;  %v286_v57 = vpop.f32.mrb[2].mxu0 }
 0x11d   :  { %v669_v58 = vpop.f32.mrb[3].mxu1  ;;  %v287_v59 = vpop.f32.mrb[3].mxu0 }
 0x13a   :  { %v532_v0 = vpop.f32.mrb[4].mxu1  ;;  %v491_v4 = vpop.f32.mrb[4].mxu0 }
 0x13b   :  { %v533_v3 = vadd.f32 %v532_v0, %v323_v52  ;;  %v688_v5 = vpop.f32.mrb[5].mxu1  ;;  %v492_v6 = vadd.f32 %v491_v4, %v282_v53  ;;  %v493_v7 = vpop.f32.mrb[5].mxu0 }
 0x13c   :  { %v535_v8 = vpop.f32.mrb[6].mxu1  ;;  %v494_v9 = vadd.f32 %v493_v7, %v284_v55  ;;  %v495_v11 = vpop.f32.mrb[6].mxu0 }
 0x13d   :  { %v689_v12 = vpop.f32.mrb[7].mxu1  ;;  %v555_v14 = vadd.f32 %v543_v2, %v492_v6  ;;  %v496_v15 = vpop.f32.mrb[7].mxu0  ;;  %v557_v18 = vadd.f32 %v551_v13, %v533_v3 }
 0x13e   :  { %v556_v19 = vadd.f32 %v547_v17, %v494_v9 }
 0x13f   :  { %v558_v16 = vmul.f32 0.5, %v555_v14 }
 0x140   :  { %v562_v20 = vmul.f32 0.5, %v556_v19 }
 0x141   :  { %761 = vtanh.f32 %v558_v16 }
 0x142   :  { %763 = vtanh.f32 %v557_v18 }
 0x143   :  { %765 = vtanh.f32 %v562_v20 }
 0x14b   :  { %v762_v21 = vpop.eup %761 }
 0x14c   :  { %v560_v22 = vmul.f32 0.5, %v762_v21  ;;  %v764_v24 = vpop.eup %763 }
 0x14d   :  { %v766_v28 = vpop.eup %765 }
 0x14e   :  { %v561_v23 = vadd.f32 0.5, %v560_v22  ;;  %v564_v29 = vmul.f32 0.5, %v766_v28 }
 0x150   :  { %v568_v26 = vmul.f32 %v764_v24, %v561_v23  ;;  %v565_v30 = vadd.f32 0.5, %v564_v29 }
 0x152   :  { %v569_v27 = vadd.f32 %v568_v26, %v567_v25 }
 0x154   :  { %767 = vtanh.f32 %v569_v27  ;;  %573 = vst [vmem:[%s935_s7] sm:$0xff] %v569_v27 }
 0x15e   :  { %v768_v31 = vpop.eup %767 }
 0x15f   :  { %v571_v32 = vmul.f32 %v768_v31, %v565_v30 }
 0x161   :  { %572 = vst [vmem:[%s934_s6] sm:$0xff] %v571_v32 }
 0x162   :  { %582 = vsyncpa [#allocation3], 1 }
 0x163   :  { %583 = vsyncpa [#allocation5], 1 }

</bundles_post_ra>
